<compile_context>
chip_gen: v5e
topology: v5e:2x2
jax: 0.10.0
libtpu: 0.0.40
codegen_flags: <defaults>
</compile_context>

<pallas_src>
import functools

import jax
import jax.numpy as jnp
from jax.experimental import pallas as pl
from jax.experimental.pallas import tpu as pltpu


def _round_up(n, m):
    return ((n + m - 1) // m) * m


def qnet_kernel(x_ref, w1_ref, b1_ref, w2_ref, b2_ref, out_ref):
    # fc1: (TB, S) @ (S, Hp), f32 accumulation on the MXU. Cast x to the
    # weight storage dtype so bf16 weights keep the bf16 MXU path.
    x = x_ref[...].astype(w1_ref.dtype)
    h = jnp.dot(x, w1_ref[...], preferred_element_type=jnp.float32)
    # Bias + ReLU epilogue in f32 on the VPU (v5e has no bf16 VPU path).
    h = jnp.maximum(h + b1_ref[...], 0.0)
    # fc2: (TB, Hp) @ (Hp, A), f32 accumulation. Padded Hp lanes are inert:
    # ReLU(0 + 0) = 0 and the corresponding w2 rows are zero.
    q = jnp.dot(h.astype(w2_ref.dtype), w2_ref[...],
                preferred_element_type=jnp.float32)
    # TODO(synk): the downstream argmax / Q(s,a) gather could be fused here so
    # the (B, A) Q-matrix never hits HBM; kept as Q-values to match the module.
    out_ref[...] = (q + b2_ref[...]).astype(out_ref.dtype)


def prepare_params(w1, b1, w2, b2, *, param_dtype=jnp.bfloat16):
    """One-time parameter prep (hoisted out of the forward hot path).

    Pads the hidden dim to a multiple of 128 lanes and casts weight storage to
    `param_dtype` (biases stay f32 for the VPU epilogue). Weights are (in, out).
    """
    S, H = w1.shape
    A = w2.shape[1]
    H_p = _round_up(H, 128)
    w1p = jnp.zeros((S, H_p), param_dtype).at[:, :H].set(w1.astype(param_dtype))
    b1p = jnp.zeros((1, H_p), jnp.float32).at[0, :H].set(b1.astype(jnp.float32))
    w2p = jnp.zeros((H_p, A), param_dtype).at[:H, :].set(w2.astype(param_dtype))
    b2p = b2.astype(jnp.float32).reshape(1, A)
    return w1p, b1p, w2p, b2p


@functools.partial(jax.jit, static_argnames=("block_b",))
def qnetwork_forward(x, w1p, b1p, w2p, b2p, *, block_b=1024):
    """Fused QNetwork forward: relu(x @ w1 + b1) @ w2 + b2 -> (B, A) float32."""
    B, S = x.shape
    H_p = w1p.shape[1]
    A = w2p.shape[1]

    if B <= block_b:
        TB = B          # single tile; block dim == full array dim is always legal
    else:
        TB = block_b    # tiled batch: tile must be sublane(8)-aligned
        assert TB % 8 == 0, "block_b must be a multiple of 8"
    grid = (pl.cdiv(B, TB),)   # partial last tile OK: OOB rows never written

    return pl.pallas_call(
        qnet_kernel,
        out_shape=jax.ShapeDtypeStruct((B, A), jnp.float32),
        grid=grid,
        in_specs=[
            pl.BlockSpec((TB, S), lambda i: (i, 0)),     # x: streamed per tile
            pl.BlockSpec((S, H_p), lambda i: (0, 0)),    # w1: VMEM-resident
            pl.BlockSpec((1, H_p), lambda i: (0, 0)),    # b1: VMEM-resident
            pl.BlockSpec((H_p, A), lambda i: (0, 0)),    # w2: VMEM-resident
            pl.BlockSpec((1, A), lambda i: (0, 0)),      # b2: VMEM-resident
        ],
        out_specs=pl.BlockSpec((TB, A), lambda i: (i, 0)),
        compiler_params=pltpu.CompilerParams(
            dimension_semantics=("parallel",),  # shard batch tiles across TCs (v7x)
        ),
    )(x, w1p, b1p, w2p, b2p)


def init_params(key, state_dim, hidden_dim, action_dim):
    """torch.nn.Linear-style init: U(-1/sqrt(fan_in), 1/sqrt(fan_in)); (in, out)."""
    k1, k2, k3, k4 = jax.random.split(key, 4)
    bound1 = 1.0 / jnp.sqrt(state_dim)
    bound2 = 1.0 / jnp.sqrt(hidden_dim)
    w1 = jax.random.uniform(k1, (state_dim, hidden_dim), jnp.float32, -bound1, bound1)
    b1 = jax.random.uniform(k2, (hidden_dim,), jnp.float32, -bound1, bound1)
    w2 = jax.random.uniform(k3, (hidden_dim, action_dim), jnp.float32, -bound2, bound2)
    b2 = jax.random.uniform(k4, (action_dim,), jnp.float32, -bound2, bound2)
    return w1, b1, w2, b2


if __name__ == "__main__":
    # Small shapes consistent with a CartPole-style Q-network.
    batch, state_dim, hidden_dim, action_dim = 8, 4, 32, 2

    key = jax.random.PRNGKey(0)
    k_x, k_p, k_big, k_odd = jax.random.split(key, 4)
    x = jax.random.normal(k_x, (batch, state_dim), jnp.float32)
    w1, b1, w2, b2 = init_params(k_p, state_dim, hidden_dim, action_dim)

    # 1) Small batch, f32 params: exact semantics vs plain-JAX reference.
    params_f32 = prepare_params(w1, b1, w2, b2, param_dtype=jnp.float32)
    q = qnetwork_forward(x, *params_f32)
    jax.block_until_ready(q)
    ref = jnp.maximum(x @ w1 + b1, 0.0) @ w2 + b2
    assert q.shape == (batch, action_dim)
    assert jnp.allclose(q, ref, atol=1e-5, rtol=1e-5)

    # 2) Uneven batch (B % TB != 0), f32: exercises the cdiv grid with a
    #    partial last tile (grid = 3 tiles of 128, last tile has 44 valid rows).
    b_odd = 300
    xo = jax.random.normal(k_odd, (b_odd, state_dim), jnp.float32)
    qo = qnetwork_forward(xo, *params_f32, block_b=128)
    jax.block_until_ready(qo)
    refo = jnp.maximum(xo @ w1 + b1, 0.0) @ w2 + b2
    assert qo.shape == (b_odd, action_dim)
    assert jnp.allclose(qo, refo, atol=1e-5, rtol=1e-5)

    # 3) Large batch, bf16 storage (default): 2 grid steps of TB=1024 so v7x's
    #    second TensorCore also gets work; weights stay VMEM-resident.
    params_bf16 = prepare_params(w1, b1, w2, b2)          # bf16 default
    big_batch = 2048
    xb = jax.random.normal(k_big, (big_batch, state_dim), jnp.float32)
    qb = qnetwork_forward(xb.astype(jnp.bfloat16), *params_bf16, block_b=1024)
    jax.block_until_ready(qb)
    # Reference that emulates the kernel's bf16 storage rounding exactly
    # (f32 MXU accumulation, f32 bias/ReLU epilogue, bf16 cast of h before fc2).
    to_f32 = lambda a: a.astype(jnp.bfloat16).astype(jnp.float32)
    h_ref = jnp.maximum(to_f32(xb) @ to_f32(w1) + b1, 0.0)
    refb = to_f32(h_ref) @ to_f32(w2) + b2
    assert qb.shape == (big_batch, action_dim)
    assert jnp.allclose(qb, refb, atol=1e-3, rtol=1e-3)

    print("KERNEL_OK")
</pallas_src>

<mosaic_0001>
module attributes {stable_mosaic.version = 11 : i64} {
  func.func @qnet_kernel(%arg0: i32, %arg1: memref<8x4xf32, #tpu.memory_space<vmem>>, %arg2: memref<4x128xf32, #tpu.memory_space<vmem>>, %arg3: memref<1x128xf32, #tpu.memory_space<vmem>>, %arg4: memref<128x2xf32, #tpu.memory_space<vmem>>, %arg5: memref<1x2xf32, #tpu.memory_space<vmem>>, %arg6: memref<8x2xf32, #tpu.memory_space<vmem>>) attributes {dimension_semantics = [#tpu.dimension_semantics<parallel>], iteration_bounds = array<i64: 1>, scalar_prefetch = 0 : i64, scratch_operands = 0 : i64, tpu.core_type = #tpu.core_type<tc>, window_params = [{transform_indices = @transform_0, window_bounds = array<i64: 8, 4>}, {pipeline_mode = #tpu.pipeline_mode<synchronous>, transform_indices = @transform_1, window_bounds = array<i64: 4, 128>}, {pipeline_mode = #tpu.pipeline_mode<synchronous>, transform_indices = @transform_2, window_bounds = array<i64: 1, 128>}, {pipeline_mode = #tpu.pipeline_mode<synchronous>, transform_indices = @transform_3, window_bounds = array<i64: 128, 2>}, {pipeline_mode = #tpu.pipeline_mode<synchronous>, transform_indices = @transform_4, window_bounds = array<i64: 1, 2>}, {transform_indices = @transform_5, window_bounds = array<i64: 8, 2>}]} {
    %c0 = arith.constant 0 : index
    %c0_0 = arith.constant 0 : index
    %0 = vector.load %arg1[%c0, %c0_0] : memref<8x4xf32, #tpu.memory_space<vmem>>, vector<8x4xf32>
    %c0_1 = arith.constant 0 : index
    %c0_2 = arith.constant 0 : index
    %1 = vector.load %arg2[%c0_1, %c0_2] : memref<4x128xf32, #tpu.memory_space<vmem>>, vector<4x128xf32>
    %cst = arith.constant dense<0.000000e+00> : vector<8x128xf32>
    %2 = tpu.matmul %0, %1, %cst {dimension_numbers = #tpu.dot_dimension_numbers<[1], [0], [0], [1], [0, 0, 1, 1], [], []>} : vector<8x4xf32>, vector<4x128xf32>, vector<8x128xf32> -> vector<8x128xf32>
    %c0_3 = arith.constant 0 : index
    %c0_4 = arith.constant 0 : index
    %3 = vector.load %arg3[%c0_3, %c0_4] : memref<1x128xf32, #tpu.memory_space<vmem>>, vector<1x128xf32>
    %4 = vector.broadcast %3 : vector<1x128xf32> to vector<8x128xf32>
    %5 = arith.addf %2, %4 : vector<8x128xf32>
    %cst_5 = arith.constant 0.000000e+00 : f32
    %6 = vector.broadcast %cst_5 : f32 to vector<8x128xf32>
    %7 = arith.maximumf %5, %6 : vector<8x128xf32>
    %c0_6 = arith.constant 0 : index
    %c0_7 = arith.constant 0 : index
    %8 = vector.load %arg4[%c0_6, %c0_7] : memref<128x2xf32, #tpu.memory_space<vmem>>, vector<128x2xf32>
    %cst_8 = arith.constant dense<0.000000e+00> : vector<8x2xf32>
    %9 = tpu.matmul %7, %8, %cst_8 {dimension_numbers = #tpu.dot_dimension_numbers<[1], [0], [0], [1], [0, 0, 1, 1], [], []>} : vector<8x128xf32>, vector<128x2xf32>, vector<8x2xf32> -> vector<8x2xf32>
    %c0_9 = arith.constant 0 : index
    %c0_10 = arith.constant 0 : index
    %10 = vector.load %arg5[%c0_9, %c0_10] : memref<1x2xf32, #tpu.memory_space<vmem>>, vector<1x2xf32>
    %11 = vector.broadcast %10 : vector<1x2xf32> to vector<8x2xf32>
    %12 = arith.addf %9, %11 : vector<8x2xf32>
    %c0_11 = arith.constant 0 : index
    %c0_12 = arith.constant 0 : index
    %13 = vector.load %arg6[%c0_11, %c0_12] : memref<8x2xf32, #tpu.memory_space<vmem>>, vector<8x2xf32>
    tpu.vector_store %arg6[%c0_11, %c0_12], %12 {strides = array<i32>} : memref<8x2xf32, #tpu.memory_space<vmem>>, vector<8x2xf32>,
    return
  }
  func.func @transform_0(%arg0: i32) -> (i32, i32) {
    %c0_i32 = arith.constant 0 : i32
    %c0_i32_0 = arith.constant 0 : i32
    return %arg0, %c0_i32 : i32, i32
  }
  func.func @transform_1(%arg0: i32) -> (i32, i32) {
    %c0_i32 = arith.constant 0 : i32
    %c0_i32_0 = arith.constant 0 : i32
    %c0_i32_1 = arith.constant 0 : i32
    return %c0_i32, %c0_i32_0 : i32, i32
  }
  func.func @transform_2(%arg0: i32) -> (i32, i32) {
    %c0_i32 = arith.constant 0 : i32
    %c0_i32_0 = arith.constant 0 : i32
    %c0_i32_1 = arith.constant 0 : i32
    return %c0_i32, %c0_i32_0 : i32, i32
  }
  func.func @transform_3(%arg0: i32) -> (i32, i32) {
    %c0_i32 = arith.constant 0 : i32
    %c0_i32_0 = arith.constant 0 : i32
    %c0_i32_1 = arith.constant 0 : i32
    return %c0_i32, %c0_i32_0 : i32, i32
  }
  func.func @transform_4(%arg0: i32) -> (i32, i32) {
    %c0_i32 = arith.constant 0 : i32
    %c0_i32_0 = arith.constant 0 : i32
    %c0_i32_1 = arith.constant 0 : i32
    return %c0_i32, %c0_i32_0 : i32, i32
  }
  func.func @transform_5(%arg0: i32) -> (i32, i32) {
    %c0_i32 = arith.constant 0 : i32
    %c0_i32_0 = arith.constant 0 : i32
    return %arg0, %c0_i32 : i32, i32
  }
}

</mosaic_0001>

<bundles_post_ra>
// kernel: qnetwork_forward.1
= control target key start
LH: loop header
LB: loop body
LE: loop exit
PB: predicated region body
PF: predicated region fallthrough
CT: control target
= control target key end

     0   :  { %vm30_vm0 = vcmask 1043456   ;;  %vm26_vm1 = vcmask 31744   ;;  %vm95_vm2 = vcmask 15360   ;;  %s198_s1 = inlined_call_operand.vmem [shape: f32[4,128], index: 1, kind: input, shape index: {}]   ;;  %s199_s0 = inlined_call_operand.vmem [shape: f32[8,4], index: 0, kind: input, shape index: {}]   ;;  %s200_s3 = inlined_call_operand.vmem [shape: f32[128,2], index: 3, kind: input, shape index: {}]   ;;  %s201_s2 = inlined_call_operand.vmem [shape: f32[1,128], index: 2, kind: input, shape index: {}]   ;;  %s202_s4 = inlined_call_operand.vmem [shape: f32[1,2], index: 4, kind: input, shape index: {}]   ;;  %s203_s5 = inlined_call_operand.vmem [shape: f32[8,2], index: 5, kind: output, shape index: {}]  }
   0x1   :  { %v21_v0 = vld [vmem:[%s198_s1] sm:$0xf]  ;;  %v70_v2 = vld [vmem:[%s200_s3 + $0x78] sm:$0xff]  ;;  %v69_v3 = vld [vmem:[%s200_s3 + $0x70] sm:$0xff] }
   0x2   :  { %v20_v1 = vld [vmem:[%s199_s0] sm:$0xff]  ;;  %101 = vmatpush.msk.msra.mxu0 %vm30_vm0, %v21_v0  ;;  %75 = vmatpush.msra.mxu1 %v70_v2  ;;  %v68_v4 = vld [vmem:[%s200_s3 + $0x68] sm:$0xff]  ;;  %v66_v6 = vld [vmem:[%s200_s3 + $0x58] sm:$0xff] }
   0x3   :  { %102 = vmatmul.msk.f32.vlgmr.msra.gmra.mxu0 %vm26_vm1, %v20_v1  ;;  %v67_v5 = vld [vmem:[%s200_s3 + $0x60] sm:$0xff]  ;;  %v65_v7 = vld [vmem:[%s200_s3 + $0x50] sm:$0xff]  ;;  %v64_v8 = vld [vmem:[%s200_s3 + $0x48] sm:$0xff] }
   0x4   :  { %76 = vmatpush.msra.mxu1 %v69_v3  ;;  %v63_v9 = vld [vmem:[%s200_s3 + $0x40] sm:$0xff]  ;;  %v62_v10 = vld [vmem:[%s200_s3 + $0x38] sm:$0xff]  ;;  %v61_v11 = vld [vmem:[%s200_s3 + $0x30] sm:$0xff] }
   0x5   :  { %v60_v12 = vld [vmem:[%s200_s3 + $0x28] sm:$0xff]  ;;  %v59_v13 = vld [vmem:[%s200_s3 + $0x20] sm:$0xff]  ;;  %v58_v14 = vld [vmem:[%s200_s3 + $0x18] sm:$0xff] }
   0x6   :  { %77 = vmatpush.msra.mxu1 %v68_v4  ;;  %v57_v15 = vld [vmem:[%s200_s3 + $0x10] sm:$0xff]  ;;  %v56_v16 = vld [vmem:[%s200_s3 + $0x8] sm:$0xff]  ;;  %v55_v17 = vld [vmem:[%s200_s3] sm:$0xff] }
   0x7   :  { %v103_v18 = vld [vmem:[%s201_s2] ss:$0 sm:$0xff] }
   0x8   :  { %78 = vmatpush.msra.mxu1 %v67_v5  ;;  %v104_v22 = vld [vmem:[%s202_s4] ss:$0 sm:$0xff] }
   0xa   :  { %79 = vmatpush.msra.mxu1 %v66_v6 }
   0xc   :  { %80 = vmatpush.msra.mxu1 %v65_v7 }
   0xe   :  { %81 = vmatpush.msra.mxu1 %v64_v8 }
  0x10   :  { %82 = vmatpush.msra.mxu1 %v63_v9 }
  0x12   :  { %83 = vmatpush.msra.mxu1 %v62_v10 }
  0x14   :  { %84 = vmatpush.msra.mxu1 %v61_v11 }
  0x16   :  { %85 = vmatpush.msra.mxu1 %v60_v12 }
  0x18   :  { %86 = vmatpush.msra.mxu1 %v59_v13 }
  0x1a   :  { %87 = vmatpush.msra.mxu1 %v58_v14 }
  0x1c   :  { %88 = vmatpush.msra.mxu1 %v57_v15 }
  0x1e   :  { %89 = vmatpush.msra.mxu1 %v56_v16 }
  0x20   :  { %90 = vmatpush.msra.mxu1 %v55_v17 }
  0x80   :  { %v51_v19 = vpop.f32.mrf.mxu0 }
  0x81   :  { %v52_v20 = vadd.f32 %v103_v18, %v51_v19 }
  0x83   :  { %v54_v21 = vmax.f32 %v52_v20, 0.0 }
  0x85   :  { %91 = vmatmul.f32.vlgmr.msra.gmra.mxu1 %v54_v21 }
 0x102   :  { %v92_v23 = vpop.f32.mrf.mxu1 }
 0x103   :  { %v93_v24 = vadd.f32 %v104_v22, %v92_v23 }
 0x105   :  { %96 = vst.msk [vmem:[%s203_s5] sm:$0xff] %vm95_vm2, %v93_v24 }

</bundles_post_ra>
